<compile_context>
chip_gen: v6e
topology: v6e:2x2x1
jax: 0.10.0
libtpu: 0.0.40
codegen_flags: <defaults>
</compile_context>

<pallas_src>
import jax
import jax.numpy as jnp
from jax.experimental import pallas as pl
from jax.experimental.pallas import tpu as pltpu


# ----------------------------------------------------------------------------
# Plain-JAX glue: SH basis evaluation (mirrors eval_sh_old), used only to build
# the synthetic sh_coeffs parameter deterministically.
# ----------------------------------------------------------------------------
def eval_sh_jax(degree, dirs):
    x, y, z = dirs[..., 0], dirs[..., 1], dirs[..., 2]
    res = []
    if degree >= 0:
        res.append(0.282095 * jnp.ones_like(x))
    if degree >= 1:
        res += [-0.488603 * y, 0.488603 * z, -0.488603 * x]
    if degree >= 2:
        res += [1.092548 * x * y,
                -1.092548 * y * z,
                0.315392 * (3 * z ** 2 - 1),
                -1.092548 * x * z,
                0.546274 * (x ** 2 - y ** 2)]
    if degree >= 3:
        res += [-0.590044 * y * (3 * x ** 2 - y ** 2),
                2.890611 * x * y * z,
                -0.457046 * y * (5 * z ** 2 - 1),
                0.373176 * z * (5 * z ** 2 - 3),
                -0.457046 * x * (5 * z ** 2 - 1),
                1.445306 * z * (x ** 2 - y ** 2),
                -0.590044 * x * (x ** 2 - 3 * y ** 2)]
    return jnp.stack(res, axis=-1)  # [..., 16]


# ----------------------------------------------------------------------------
# Pixel-blend kernel (transposed, lane-dense):
#   color_ref : [C, N]       bf16, resident across the grid (tiny LHS)
#   t_ref     : [N, TP]      bf16, streamed pixel-column tile of T_alpha^T
#   o_ref     : [C, TP]      f32, lane-dense output (lanes = pixels)
# ----------------------------------------------------------------------------
def blend_kernel(color_ref, t_ref, o_ref):
    o_ref[...] = jnp.dot(color_ref[...], t_ref[...],
                         preferred_element_type=jnp.float32)


def _vmem_capacity_bytes():
    """Per-core VMEM capacity; conservative (v7x = 64 MiB) fallback."""
    try:
        info = pltpu.get_tpu_info()
        for attr in ("vmem_capacity_bytes", "vmem_bytes", "vmem_size_bytes"):
            v = getattr(info, attr, None)
            if v:
                return int(v)
    except Exception:
        pass
    return 64 << 20


def _choose_tile_p(P, N, t_itemsize, budget_bytes, min_steps=4):
    """Largest 128-multiple pixel tile whose double-buffered T tile + output
    double-buffer fit `budget_bytes`, while keeping >= min_steps grid steps
    (v7x megacore sharding + DMA/compute overlap)."""
    per_col = 2 * N * t_itemsize + 2 * 8 * 4   # T dbl-buf + (3->8 sublane) f32 out dbl-buf
    max_tile = budget_bytes // max(1, per_col)
    target = pl.cdiv(P, min_steps)
    tile = min(int(max_tile), int(target))
    tile = (tile // 128) * 128
    # NOTE: the 128-lane floor can exceed the budget for extremely large N;
    # the vmem_limit headroom below absorbs moderate overshoot.
    tile = max(tile, 128)
    return int(min(tile, P))


def rasterize_forward(sh_coeffs, x, t_alpha_T, H, W):
    """Forward pass.

    sh_coeffs : [N, K]  f32   (fixed parameter)
    x         : [N, K, C] f32 (per-call input)
    t_alpha_T : [N, P]  bf16  (fixed parameter, pre-transposed + pre-cast at init)
    """
    N, K = sh_coeffs.shape
    C = x.shape[2]
    Np, P = t_alpha_T.shape
    assert Np == N and P == H * W

    # ---- stage 1 (plain XLA, one fused pass): SH contraction + relu,
    #      emitted directly as the lane-dense bf16 [C, N] blend LHS. ----------
    color_cn = jnp.einsum("nk,nkc->cn", sh_coeffs, x)           # [C, N] f32
    color_cn = jnp.maximum(color_cn + 0.5, 0.0).astype(t_alpha_T.dtype)

    # ---- stage 2: pixel blend on the MXU, streamed over pixel-column tiles -
    t_itemsize = jnp.dtype(t_alpha_T.dtype).itemsize
    vmem_cap = _vmem_capacity_bytes()
    # resident LHS footprint: 3 -> 8 sublanes, N -> 128-lane padded, bf16
    color_vmem = 8 * pl.cdiv(N, 128) * 128 * t_itemsize
    budget = max((vmem_cap * 3) // 8 - color_vmem, 1 << 20)
    vmem_limit = int((vmem_cap * 5) // 8)

    tile_p = _choose_tile_p(P, N, t_itemsize, budget)
    grid_p = pl.cdiv(P, tile_p)

    cost = pl.CostEstimate(
        flops=2 * P * N * C,
        transcendentals=0,
        bytes_accessed=P * N * t_itemsize + N * C * t_itemsize + P * C * 4)

    out_cp = pl.pallas_call(
        blend_kernel,
        out_shape=jax.ShapeDtypeStruct((C, P), jnp.float32),
        grid_spec=pltpu.PrefetchScalarGridSpec(
            num_scalar_prefetch=0,
            grid=(grid_p,),
            in_specs=[pl.BlockSpec((C, N), lambda i: (0, 0)),        # resident LHS
                      pl.BlockSpec((N, tile_p), lambda i: (0, i))],  # streamed T^T
            out_specs=pl.BlockSpec((C, tile_p), lambda i: (0, i)),   # lane-dense out
        ),
        compiler_params=pltpu.CompilerParams(
            dimension_semantics=("parallel",),       # v7x: shard pixels over 2 TCs
            vmem_limit_bytes=vmem_limit),
        cost_estimate=cost,
    )(color_cn, t_alpha_T)

    # tiny [3, P] -> (H, W, 3)
    return jnp.transpose(out_cp, (1, 0)).reshape(H, W, C)


# Pure-JAX reference of the PyTorch forward (for correctness check).
# Uses the exact bf16-rounded T parameter the kernel streams, and rounds the
# color through the same compute dtype, so the comparison is tight while the
# kernel keeps its bf16 HBM stream (f32 accumulation keeps end-to-end error
# ~1e-3 relative vs. pure-f32 PyTorch semantics).
def reference_forward(sh_coeffs, x, t_alpha_T, H, W):
    color = jnp.sum(sh_coeffs[:, :, None] * x, axis=1)          # [N, C]
    color_rgb = jnp.maximum(color + 0.5, 0.0)
    color_r = color_rgb.astype(t_alpha_T.dtype).astype(jnp.float32)
    t_r = jnp.transpose(t_alpha_T.astype(jnp.float32), (1, 0))  # [P, N]
    res2 = t_r @ color_r                                        # [P, C]
    return res2.reshape(H, W, -1)


if __name__ == "__main__":
    # Small shapes consistent with the module's forward:
    #   N gaussians, K = (sh_degree+1)^2 = 16 SH basis, C = 3 color channels,
    #   image H x W pixels.
    H, W = 16, 16
    P = H * W
    N, K, C = 64, 16, 3

    key = jax.random.PRNGKey(0)
    k_dirs, k_x, k_alpha = jax.random.split(key, 3)

    # --- synthetic deterministic "module parameters" -------------------------
    # sh_coeffs: SH basis evaluated at random unit ray directions -> [N, K]
    dirs = jax.random.normal(k_dirs, (N, 3), dtype=jnp.float32)
    dirs = dirs / jnp.linalg.norm(dirs, axis=1, keepdims=True)
    sh_coeffs = eval_sh_jax(3, dirs).astype(jnp.float32)         # [N, 16]

    # T_alpha_unsorted: per-pixel/per-gaussian blend weights -> [P, N]
    alpha = 0.5 * jax.random.uniform(k_alpha, (P, N), dtype=jnp.float32)
    alpha = jnp.minimum(alpha, 0.99)
    T = jnp.cumprod(
        jnp.concatenate([jnp.ones((P, 1), jnp.float32), 1.0 - alpha[:, :-1]],
                        axis=1), axis=1)
    t_alpha_unsorted = T * alpha                                 # [P, N] f32

    # __init__-time precompute (per perf review): store the fixed blend
    # weights pre-transposed [N, P] and in bf16 so forward() has no per-call
    # cast/transpose pass over the dominant P*N stream.
    t_alpha_T = jnp.transpose(t_alpha_unsorted, (1, 0)).astype(jnp.bfloat16)

    # --- forward input x: per-gaussian SH color coefficients [N, K, C] -------
    x = 0.3 * jax.random.normal(k_x, (N, K, C), dtype=jnp.float32)

    # --- run kernel and verify ------------------------------------------------
    out = rasterize_forward(sh_coeffs, x, t_alpha_T, H, W)
    out = jax.block_until_ready(out)

    ref = reference_forward(sh_coeffs, x, t_alpha_T, H, W)
    assert out.shape == (H, W, C), out.shape
    max_err = float(jnp.max(jnp.abs(out - ref)))
    assert max_err < 1e-2, max_err

    print("KERNEL_OK")
</pallas_src>

<mosaic_0001>
module attributes {stable_mosaic.version = 11 : i64} {
  func.func @blend_kernel(%arg0: i32, %arg1: memref<3x64xbf16, #tpu.memory_space<vmem>>, %arg2: memref<64x128xbf16, #tpu.memory_space<vmem>>, %arg3: memref<3x128xf32, #tpu.memory_space<vmem>>) attributes {dimension_semantics = [#tpu.dimension_semantics<parallel>], iteration_bounds = array<i64: 2>, scalar_prefetch = 0 : i64, scratch_operands = 0 : i64, tpu.core_type = #tpu.core_type<tc>, window_params = [{pipeline_mode = #tpu.pipeline_mode<synchronous>, transform_indices = @transform_0, window_bounds = array<i64: 3, 64>}, {transform_indices = @transform_1, window_bounds = array<i64: 64, 128>}, {transform_indices = @transform_2, window_bounds = array<i64: 3, 128>}]} {
    %c0 = arith.constant 0 : index
    %c0_0 = arith.constant 0 : index
    %0 = vector.load %arg1[%c0, %c0_0] : memref<3x64xbf16, #tpu.memory_space<vmem>>, vector<3x64xbf16>
    %c0_1 = arith.constant 0 : index
    %c0_2 = arith.constant 0 : index
    %1 = vector.load %arg2[%c0_1, %c0_2] : memref<64x128xbf16, #tpu.memory_space<vmem>>, vector<64x128xbf16>
    %cst = arith.constant dense<0.000000e+00> : vector<3x128xf32>
    %2 = tpu.matmul %0, %1, %cst {dimension_numbers = #tpu.dot_dimension_numbers<[1], [0], [0], [1], [0, 0, 1, 1], [], []>} : vector<3x64xbf16>, vector<64x128xbf16>, vector<3x128xf32> -> vector<3x128xf32>
    %c0_3 = arith.constant 0 : index
    %c0_4 = arith.constant 0 : index
    %3 = vector.load %arg3[%c0_3, %c0_4] : memref<3x128xf32, #tpu.memory_space<vmem>>, vector<3x128xf32>
    tpu.vector_store %arg3[%c0_3, %c0_4], %2 {strides = array<i32>} : memref<3x128xf32, #tpu.memory_space<vmem>>, vector<3x128xf32>,
    return
  }
  func.func @transform_0(%arg0: i32) -> (i32, i32) {
    %c0_i32 = arith.constant 0 : i32
    %c0_i32_0 = arith.constant 0 : i32
    %c0_i32_1 = arith.constant 0 : i32
    return %c0_i32, %c0_i32_0 : i32, i32
  }
  func.func @transform_1(%arg0: i32) -> (i32, i32) {
    %c0_i32 = arith.constant 0 : i32
    %c0_i32_0 = arith.constant 0 : i32
    return %c0_i32, %arg0 : i32, i32
  }
  func.func @transform_2(%arg0: i32) -> (i32, i32) {
    %c0_i32 = arith.constant 0 : i32
    %c0_i32_0 = arith.constant 0 : i32
    return %c0_i32, %arg0 : i32, i32
  }
}

</mosaic_0001>

<bundles_post_ra>
// kernel: tpu_custom_call.1
= control target key start
LH: loop header
LB: loop body
LE: loop exit
PB: predicated region body
PF: predicated region fallthrough
CT: control target
= control target key end

     0   :  { %7 = vsyncpa [#allocation3], 0  ;;  %s778_s0 = inlined_call_operand.hbm [shape: bf16[3,64], index: 0, kind: input, shape index: {}]   ;;  %s779_s1 = inlined_call_operand.hbm [shape: bf16[64,256], index: 1, kind: input, shape index: {}]   ;;  %s780_s2 = inlined_call_operand.hbm [shape: f32[3,256], index: 2, kind: output, shape index: {}]  }
   0x1   :  { %8 = vsyncpa [#allocation6], 0 }
   0x2   :  { %10 = vsyncpa [#allocation6 + $0x1], 0 }
   0x3   :  { %11 = vsyncpa [#allocation4], 0 }
   0x4   :  { %13 = vsyncpa [#allocation4 + $0x1], 0  ;;  %s598_s9 = smov 0   ;;  %s600_s10 = smov 0  }
   0x5   :  { %s602_s11 = smov 0   ;;  %s604_s12 = smov 0  }
   0x6 LB: > { %s619_s13 = sadd.s32 4294967295, %s573_s12   ;;  %s349_s14 = sadd.s32 4294967294, %s573_s12   ;;  %s573_s12 = sphi %s604_s12, %s803_s12   ;;  %s569_s11 = sphi %s602_s11, %s802_s11   ;;  %s565_s10 = sphi %s600_s10, %s801_s10   ;;  %s561_s9 = sphi %s598_s9, %s800_s9  }
   0x7   : > { %s623_s15 = sadd.s32 1, %s573_s12   ;;  %s47_s16 = sadd.s32 1, %s569_s11 }
   0x8   : > { %s44_s17 = ssub.s32 %s573_s12, %s623_s15  ;;  %p54_p0 = scmp.ne.s32.totalorder %s569_s11, %s565_s10 }
   0x9   : > { %p45_p1 = scmp.eq.s32.totalorder %s44_s17, 0  ;;  %p55_p2 = scmp.eq.s32.totalorder %s573_s12, 0 }
   0xa   : > { %p60_p3 = scmp.ne.s32.totalorder %s565_s10, %s561_s9  ;;  %p781_p4 = scmp.eq.s32.totalorder %s619_s13, 0 }
   0xb   : > { %s635_s18 = scalar_select %p45_p1, %s569_s11, %s47_s16  }
   0xc   : > { %p637_p5 = por %p55_p2, %p54_p0  ;;  %p643_p6 = por %p781_p4, %p60_p3 }
   0xd   : > { %p84_p7 = scmp.eq.s32.totalorder %s619_s13, 1  ;;  %p90_p8 = scmp.eq.s32.totalorder %s349_s14, 1 }
   0xe   : > { %s786_s20 = scalar_select %p643_p6, 1, 0 }
   0xf   : > { %p350_p9 = scmp.ge.s32.totalorder %s573_s12, 1  ;;  %p97_p10 = scmp.lt.s32.totalorder %s573_s12, 3 }
  0x10   : > { %p650_p11 = por %p84_p7, %p54_p0  ;;  %p654_p12 = por %p90_p8, %p60_p3 }
  0x11   : > { %p658_p13 = pnand %p350_p9, %p97_p10  ;;  %s575_s24 = smov [#allocation2]  }
  0x12   : > { %s787_s21 = scalar_select %p650_p11, 1, 0 }
  0x13   : > { %s788_s22 = scalar_select %p654_p12, 1, 0 }
  0x14   : > { %s789_s23 = scalar_select %p658_p13, 1, 0 }
  0x15   : > { %p393_p2 = pneg %p658_p13  ;;  %s110_s25 = sshll.u32 %s575_s24, 4  ;;  %s111_s25 = int_to_ptr.vmem [resolvable:$true] %s110_s25 }
  0x16   : > { %p406_p4 = scmp.lt.s32.totalorder %s573_s12, 2  ;;  %p790_p0 = scmp.eq.s32.totalorder %s619_s13, 0 }
  0x17   : > { %s121_s27 = sand.u32 1, %s569_s11   ;;  %s462_s30 = scalar_lea.vmem %s111_s25, 32 }
  0x18   : > { %p668_p7 = pnand %p393_p2, %p790_p0  ;;  %p675_p3 = pnand %p406_p4, %p637_p5 }
  0x19   : > { %s353_s29 = sshll.u32 %s121_s27, 5  ;;  %p463_p9 = scmp.ne.s32.totalorder %s111_s25, %s462_s30 }
  0x1a   : > { %p453_p8 = pneg %p668_p7  ;;  %p470_p12 = scmp.lt.s32.totalorder %s111_s25, %s111_s25 }
  0x1b   : > { %p471_p11 = scmp.lt.s32.totalorder %s462_s30, %s462_s30 }
  0x1c   : > { %p465_p10 = pnand %p463_p9, %p453_p8 }
  0x1d   : > { %p472_p2 = por %p471_p11, %p470_p12 }
  0x1e   : > { %p466_p1 = pneg %p465_p10 }
  0x20   : > { %p473_p0 = pnand %p472_p2, %p466_p1 }
  0x22   : > { %476 = shalt.err (!%p473_p0)
}
  0x23   : > { %396 = dma.hbm_to_vmem [thread:$0]  (!%p668_p7), %s778_s0, 32, %s111_s25, [#allocation3]  }
  0x24   : > { %s354_s5 = sshll.u32 %s573_s12, 6  ;;  %s125_s6 = scalar_lea.vmem [#allocation5], %s353_s29 }
  0x25   : > { %s131_s7 = sshll.u32 %s125_s6, 4  ;;  %s690_s16 = scalar_lea.hbm %s779_s1, %s354_s5  ;;  %s692_s7 = int_to_ptr.vmem [resolvable:$true] %s131_s7 }
  0x26   : > { %s694_s17 = scalar_lea.sflag [#allocation6], %s121_s27  ;;  %s477_s19 = scalar_lea.hbm %s690_s16, 512 }
  0x27   : > { %p478_p4 = scmp.ne.s32.totalorder %s690_s16, %s477_s19  ;;  %p479_p5 = pneg %p675_p3 }
  0x28   : > { %s482_s26 = scalar_lea.hbm %s779_s1, 1024  ;;  %p483_p1 = scmp.lt.s32.totalorder %s690_s16, %s779_s1 }
  0x29   : > { %p480_p11 = pnand %p479_p5, %p478_p4  ;;  %p484_p7 = scmp.lt.s32.totalorder %s482_s26, %s477_s19 }
  0x2b   : > { %p481_p12 = pneg %p480_p11  ;;  %p485_p8 = por %p484_p7, %p483_p1 }
  0x2d   : > { %p486_p9 = pnand %p485_p8, %p481_p12 }
  0x2f   : > { %489 = shalt.err (!%p486_p9)
}
  0x30   : > { %s490_s27 = scalar_lea.vmem %s692_s7, 512  ;;  %s576_s3 = smov [#allocation5]  }
  0x31   : > { %p491_p10 = scmp.ne.s32.totalorder %s692_s7, %s490_s27  ;;  %s495_s4 = sshll.u32 %s576_s3, 4  ;;  %s496_s4 = int_to_ptr.vmem [resolvable:$false] %s495_s4 }
  0x32   : > { %s497_s5 = scalar_lea.vmem %s496_s4, 1024  ;;  %p498_p4 = scmp.lt.s32.totalorder %s692_s7, %s496_s4 }
  0x33   : > { %p493_p2 = pnand %p491_p10, %p479_p5  ;;  %p499_p11 = scmp.lt.s32.totalorder %s497_s5, %s490_s27 }
  0x35   : > { %p494_p0 = pneg %p493_p2  ;;  %p500_p6 = por %p499_p11, %p498_p4 }
  0x37   : > { %p501_p13 = pnand %p500_p6, %p494_p0 }
  0x39   : > { %504 = shalt.err (!%p501_p13)
}
  0x3a   : > { %s577_s6 = smov 128   ;;  %s578_s8 = smov 64  }
  0x3b   : > { %s579_s14 = smov 4   ;;  %p793_p5 = scmp.ne.s32.totalorder %s789_s23, 0 }
  0x3c   : > { %400 = dma.hbm_to_vmem [thread:$0]  (!%p675_p3), %s690_s16, 512, %s692_s7, %s694_s17, %s577_s6, %s578_s8, %s579_s14  }
  0x3d   : > { %143 = sbr.rel (%p793_p5) target bundleno = 297 (0x129), region = 28  ;;  %p794_p12 = scmp.eq.s32.totalorder (!%p793_p5), %s619_s13, 0 }
  0x42   : > { %548 = dma.done.wait (%p794_p12), [#allocation3], 32   ;;  %p795_p1 = pmov %p794_p12 }
  0x43   : > { %s722_s19 = sand.u32 1, %s565_s10   ;;  %p796_p6 = scmp.ne.s32.totalorder %s786_s20, 0 }
  0x44   : > { %550 = vsyncadd (%p795_p1), [#allocation3], 4294967264  ;;  %s357_s24 = sshll.u32 %s722_s19, 5  ;;  %s150_s25 = scalar_lea.sflag [#allocation6], %s722_s19 }
  0x45   : > { %s153_s26 = scalar_lea.vmem [#allocation5], %s357_s24 }
  0x46   : > { %552 = dma.done.wait (%p796_p6), %s150_s25, 512  }
  0x47   : > { %554 = vsyncadd (%p796_p6), %s150_s25, 4294966784  ;;  %v580_v0 = vmov 0.0   ;;  %vm581_vm0 = vmmov 0   ;;  %v447_v1 = vld [vmem:[%s153_s26 + $0x18] sm:$0xff]   ;;  %v448_v2 = vld [vmem:[%s153_s26 + $0x10] sm:$0xff]   ;;  %vm208_vm1 = vcmask 523264  }
  0x48   : > { %373 = vmatprep.subr.bf16.mxu0 %v580_v0  ;;  %381 = vmatprep.mubr.msk.bf16.mxu0 %vm581_vm0, %v580_v0  ;;  %v449_v3 = vld [vmem:[%s153_s26 + $0x8] sm:$0xff]   ;;  %v450_v4 = vld [vmem:[%s153_s26] sm:$0xff]   ;;  %v175_v5 = vld [vmem:[#allocation2] sm:$0x3]  ;;  %s358_s20 = sshll.u32 %s722_s19, 2  ;;  %s365_s7 = sshll.u32 %s619_s13, 6 }
  0x49   : > { %374 = vmatpush3.bf16.msra.mxu0 %v447_v1  ;;  %s173_s23 = scalar_lea.vmem [#allocation7], %s358_s20  ;;  %s737_s29 = scalar_lea.hbm %s780_s2, %s365_s7 }
  0x4a   : > { %375 = vmatprep.subr.bf16.mxu0 %v580_v0  ;;  %s267_s28 = sshll.u32 %s173_s23, 4  ;;  %s254_s30 = scalar_lea.sflag [#allocation4], %s722_s19  ;;  %s732_s28 = int_to_ptr.vmem [resolvable:$true] %s267_s28 }
  0x4b   : > { %s505_s27 = scalar_lea.vmem %s732_s28, 64  ;;  %p797_p3 = scmp.ne.s32.totalorder %s787_s21, 0 }
  0x4c   : > { %p506_p13 = scmp.ne.s32.totalorder %s732_s28, %s505_s27  ;;  %s582_s13 = smov [#allocation7]  }
  0x4d   : > { %376 = vmatpush3.bf16.msra.mxu0 %v448_v2  ;;  %s509_s3 = sshll.u32 %s582_s13, 4  ;;  %s510_s3 = int_to_ptr.vmem [resolvable:$false] %s509_s3 }
  0x4e   : > { %377 = vmatprep.subr.bf16.mxu0 %v580_v0  ;;  %p507_p7 = pnand %p506_p13, %p797_p3  ;;  %s511_s4 = scalar_lea.vmem %s510_s3, 128 }
  0x4f   : > { %p512_p9 = scmp.lt.s32.totalorder %s732_s28, %s510_s3  ;;  %p513_p10 = scmp.lt.s32.totalorder %s511_s4, %s505_s27 }
  0x50   : > { %p508_p8 = pneg %p507_p7 }
  0x51   : > { %378 = vmatpush3.bf16.msra.mxu0 %v449_v3  ;;  %p514_p2 = por %p513_p10, %p512_p9 }
  0x52   : > { %379 = vmatprep.subr.bf16.mxu0 %v580_v0 }
  0x53   : > { %p515_p0 = pnand %p514_p2, %p508_p8 }
  0x55   : > { %380 = vmatpush3.bf16.msra.mxu0 %v450_v4 }
  0x58   : > { %382 = vmatmul.mubr.msk.bf16.vlgmr.msra.gmra.mxu0 %vm208_vm1, %v175_v5 }
 0x118   : > { %v246_v6 = vpop.f32.mrf.mxu0 }
 0x119   : > { %252 = vst [vmem:[%s173_s23] sm:$0x7] %v246_v6 }
 0x11a   : > { %v383_v7 = vpop.f32.mrf.mxu0 }
 0x11b   : > { %518 = shalt.err (!%p515_p0)
}
 0x11c   : > { %s519_s5 = scalar_lea.hbm %s737_s29, 64  ;;  %s523_s14 = scalar_lea.hbm %s780_s2, 128 }
 0x11d   : > { %p520_p4 = scmp.ne.s32.totalorder %s737_s29, %s519_s5  ;;  %p524_p12 = scmp.lt.s32.totalorder %s737_s29, %s780_s2 }
 0x11e   : > { %p525_p1 = scmp.lt.s32.totalorder %s523_s14, %s519_s5 }
 0x11f   : > { %p521_p11 = pnand %p520_p4, %p797_p3 }
 0x120   : > { %p526_p6 = por %p525_p1, %p524_p12 }
 0x121   : > { %p522_p5 = pneg %p521_p11 }
 0x123   : > { %p527_p13 = pnand %p526_p6, %p522_p5 }
 0x125   : > { %530 = shalt.err (!%p527_p13)
}
 0x126   : > { %391 = dma.vmem_to_hbm [thread:$0]  (%p797_p3), %s732_s28, 64, %s737_s29, %s254_s30   ;;  %v249_v8 = vpop.f32.mrf.mxu0 }
 0x128   : > { %v384_v9 = vpop.f32.mrf.mxu0 }
 0x129 PF: > { %s279_s25 = sand.u32 1, %s561_s9   ;;  %p798_p7 = scmp.ne.s32.totalorder %s788_s22, 0 }
 0x12a   : > { %p799_p8 = scmp.ge.s32.totalorder %s573_s12, 2  ;;  %s280_s26 = scalar_lea.sflag [#allocation4], %s279_s25 }
 0x12c   : > { %p402_p9 = pnand %p799_p8, %p798_p7 }
 0x12e   : > { %p403_p10 = pneg %p402_p9 }
 0x130   : > { %556 = dma.done.wait (%p403_p10), %s280_s26, 64  }
 0x131   : > { %558 = vsyncadd (%p403_p10), %s280_s26, 4294967232  ;;  %p16_p3 = scmp.ge.s32.totalorder %s623_s15, 4   ;;  %s800_s9 = smov %s565_s10 }
 0x132   : > { %s801_s10 = smov %s569_s11  ;;  %s802_s11 = smov %s635_s18 }
 0x133   : > { %s803_s12 = smov %s623_s15  ;;  %18 = sbr.rel (!%p16_p3) target bundleno = 6 (0x6), region = 78 }
 0x138   :  { %285 = vsyncpa [#allocation3], 1 }
 0x139   :  { %287 = vsyncpa [#allocation3 + $0x1], 1 }
 0x13a   :  { %288 = vsyncpa [#allocation6], 1 }
 0x13b   :  { %290 = vsyncpa [#allocation6 + $0x1], 1 }
 0x13c   :  { %291 = vsyncpa [#allocation4], 1 }
 0x13d   :  { %293 = vsyncpa [#allocation4 + $0x1], 1 }

</bundles_post_ra>
